<compile_context>
chip_gen: v5e
topology: v5e:2x2
jax: 0.10.0
libtpu: 0.0.40
codegen_flags: <defaults>
</compile_context>

<pallas_src>
import functools

import jax
import jax.numpy as jnp
from jax.experimental import pallas as pl
from jax.experimental.pallas import tpu as pltpu


# ----------------------------- config ---------------------------------------
class _Cfg:
    pass


def make_conf(S=2, B=1, C=2, in_dim=256, int_dim=32):
    conf = _Cfg()
    conf.grid = _Cfg()
    conf.grid.S, conf.grid.B, conf.grid.C = S, B, C
    conf.linear = _Cfg()
    conf.linear.in_dim = in_dim
    conf.linear.int_dim = int_dim
    conf.linear.out_dim = S * S * (B * 5 + C)
    return conf


LANE = 128  # TPU lane width; output columns are padded to a multiple of this.


# ----------------------------- kernel ---------------------------------------
def fc_kernel(x_ref, w1_ref, b1_ref, w2_ref, b2_ref, o_ref, *, neg_slope):
    # x arrives as f32 straight from HBM (only 4 B/elem of x traffic total);
    # cast to bf16 here so the MXU still sees a bf16 x bf16 matmul.
    x = x_ref[...].astype(w1_ref.dtype)

    # ---- lin1 (+ folded BN1): Linear(in_dim -> int_dim) on the MXU ----------
    h = jnp.dot(x, w1_ref[...], preferred_element_type=jnp.float32)
    h = h + b1_ref[...]

    # ---- leaky_relu(negative_slope=0.1) -------------------------------------
    h = jnp.where(h > 0.0, h, neg_slope * h)

    # ---- Dropout1d(p=0.5): eval mode -> identity ----------------------------

    # ---- lin2 (+ folded BN2): Linear(int_dim -> out_pad) on the MXU ---------
    y = jnp.dot(h.astype(w2_ref.dtype), w2_ref[...],
                preferred_element_type=jnp.float32)
    y = y + b2_ref[...]

    # ---- sigmoid: exp + approx reciprocal on the EUP (no VPU divide) --------
    # Clamp the exponent so exp never produces inf, and clip the approx
    # reciprocal's tiny overshoot back into [0, 1].
    y = jnp.maximum(y, -30.0)
    s = pl.reciprocal(1.0 + jnp.exp(-y), approx=True)
    o_ref[...] = jnp.clip(s, 0.0, 1.0).astype(o_ref.dtype)


# ----------------------------- param preparation ------------------------------
def fold_bn_params(params, conf, eps=1e-5, weight_dtype=jnp.bfloat16):
    """Fold eval-mode BN into the linear layers, transpose to (in, out),
    zero-pad layer-2 columns to a lane-dense width.  Call once, outside the
    per-forward hot path."""
    out_dim = conf.linear.out_dim
    out_pad = LANE * ((out_dim + LANE - 1) // LANE)

    # layer 1: y = gamma*( (x@W1^T + b1) - mean )*rsqrt(var+eps) + beta
    s1 = params["bn1_gamma"] * jax.lax.rsqrt(params["bn1_var"] + eps)
    w1 = (params["w1"].T * s1[None, :]).astype(weight_dtype)          # (in, int)
    b1 = ((params["b1"] - params["bn1_mean"]) * s1 + params["bn1_beta"])
    b1 = b1.reshape(1, -1).astype(jnp.float32)                        # (1, int)

    # layer 2 (then pad columns out_dim -> out_pad with zeros)
    s2 = params["bn2_gamma"] * jax.lax.rsqrt(params["bn2_var"] + eps)
    w2 = params["w2"].T * s2[None, :]                                  # (int, out)
    b2 = (params["b2"] - params["bn2_mean"]) * s2 + params["bn2_beta"]
    w2 = jnp.pad(w2, ((0, 0), (0, out_pad - out_dim))).astype(weight_dtype)
    b2 = jnp.pad(b2, (0, out_pad - out_dim)).reshape(1, -1).astype(jnp.float32)

    return {"w1": w1, "b1": b1, "w2": w2, "b2": b2, "out_pad": out_pad}


# ----------------------------- wrapper ---------------------------------------
def _choose_tm(n, cap=2048):
    """Rows per grid step.

    Multiple of 16, capped at `cap` rows (footprint at tm=2048: ~2 MiB f32 x +
    ~0.5 MiB bf16 out, double-buffered -> ~5 MiB, far under the 32 MiB scoped
    VMEM limit on every generation, including v7x's 64 MiB physical VMEM).
    The grid is chosen to have an even number (>=2) of steps whenever the batch
    is larger than one tiny block, so v7x's two TensorCores split the work
    evenly under dimension_semantics=("parallel",)."""
    if n <= 16:
        return max(8, 8 * ((n + 7) // 8))      # one block covering the tiny batch
    n_tiles = 2
    while (n + n_tiles - 1) // n_tiles > cap:
        n_tiles += 2
    return 16 * (((n + n_tiles - 1) // n_tiles + 15) // 16)


def fc_layer_forward(x_nchw, folded, conf, *, tm=None):
    """x_nchw: (N, C, H, W) float32.  `folded` from fold_bn_params.
    Returns (N, S, S, B*5 + C) float32."""
    N = x_nchw.shape[0]
    in_dim = conf.linear.in_dim
    int_dim = conf.linear.int_dim
    out_dim = conf.linear.out_dim
    out_pad = folded["out_pad"]

    # Glue: flatten exactly like nn.Flatten() on NCHW (row-major).  No dtype
    # cast and no row padding here -- either would add a full extra HBM pass
    # over x; the bf16 cast happens inside the kernel and the ragged last grid
    # block is handled by Pallas.
    x_flat = x_nchw.reshape(N, -1)
    assert x_flat.shape[1] == in_dim

    tm = _choose_tm(N) if tm is None else tm
    n_tiles = pl.cdiv(N, tm)

    full = lambda shape: pl.BlockSpec(shape, lambda i: (0, 0))
    kernel = functools.partial(fc_kernel, neg_slope=0.1)

    flops = 2 * N * (in_dim * int_dim + int_dim * out_pad)
    bytes_accessed = (N * in_dim * 4                       # x read (f32)
                      + N * out_pad * 2                    # out write (bf16)
                      + (in_dim * int_dim + int_dim * out_pad) * 2   # weights
                      + (int_dim + out_pad) * 4)           # biases

    out = pl.pallas_call(
        kernel,
        out_shape=jax.ShapeDtypeStruct((N, out_pad), jnp.bfloat16),
        grid_spec=pltpu.PrefetchScalarGridSpec(
            num_scalar_prefetch=0,
            grid=(n_tiles,),
            in_specs=[
                pl.BlockSpec((tm, in_dim), lambda i: (i, 0)),   # x (f32)
                full((in_dim, int_dim)),                        # w1 (BN folded, bf16)
                full((1, int_dim)),                             # b1 (BN folded, f32)
                full((int_dim, out_pad)),                       # w2 (BN folded, padded, bf16)
                full((1, out_pad)),                             # b2 (BN folded, padded, f32)
            ],
            out_specs=pl.BlockSpec((tm, out_pad), lambda i: (i, 0)),
        ),
        compiler_params=pltpu.CompilerParams(
            dimension_semantics=("parallel",),
            vmem_limit_bytes=32 << 20),
        cost_estimate=pl.CostEstimate(
            flops=flops,
            transcendentals=N * out_pad,
            bytes_accessed=bytes_accessed),
    )(x_flat, folded["w1"], folded["b1"], folded["w2"], folded["b2"])

    # Glue: drop padded lanes, back to f32, reshape like torch.
    S, B, C = conf.grid.S, conf.grid.B, conf.grid.C
    return out[:, :out_dim].astype(jnp.float32).reshape(N, S, S, B * 5 + C)


# ----------------------------- params ----------------------------------------
def init_params(key, conf):
    in_dim, int_dim, out_dim = (conf.linear.in_dim, conf.linear.int_dim,
                                conf.linear.out_dim)
    ks = jax.random.split(key, 8)
    p = {
        # torch nn.Linear convention: weight is (out_features, in_features)
        "w1": jax.random.normal(ks[0], (int_dim, in_dim), jnp.float32) * 0.05,
        "b1": jax.random.normal(ks[1], (int_dim,), jnp.float32) * 0.05,
        "w2": jax.random.normal(ks[2], (out_dim, int_dim), jnp.float32) * 0.05,
        "b2": jax.random.normal(ks[3], (out_dim,), jnp.float32) * 0.05,
        # BatchNorm1d params + running stats (eval mode)
        "bn1_gamma": 1.0 + 0.1 * jax.random.normal(ks[4], (int_dim,), jnp.float32),
        "bn1_beta": 0.1 * jax.random.normal(ks[5], (int_dim,), jnp.float32),
        "bn1_mean": 0.1 * jax.random.normal(ks[6], (int_dim,), jnp.float32),
        "bn1_var": jnp.abs(jax.random.normal(ks[7], (int_dim,), jnp.float32)) + 0.5,
        "bn2_gamma": jnp.ones((out_dim,), jnp.float32),
        "bn2_beta": jnp.zeros((out_dim,), jnp.float32),
        "bn2_mean": jnp.zeros((out_dim,), jnp.float32),
        "bn2_var": jnp.ones((out_dim,), jnp.float32),
    }
    return p


# ----------------------------- reference (pure JAX, f32) -----------------------
def fc_layer_ref(x_nchw, params, conf, eps=1e-5):
    N = x_nchw.shape[0]
    x = x_nchw.reshape(N, -1)
    h = x @ params["w1"].T + params["b1"]
    h = (h - params["bn1_mean"]) / jnp.sqrt(params["bn1_var"] + eps)
    h = h * params["bn1_gamma"] + params["bn1_beta"]
    h = jnp.where(h > 0, h, 0.1 * h)
    y = h @ params["w2"].T + params["b2"]
    y = (y - params["bn2_mean"]) / jnp.sqrt(params["bn2_var"] + eps)
    y = y * params["bn2_gamma"] + params["bn2_beta"]
    y = jax.nn.sigmoid(y)
    S, B, C = conf.grid.S, conf.grid.B, conf.grid.C
    return y.reshape(N, S, S, B * 5 + C)


# ----------------------------- main -------------------------------------------
if __name__ == "__main__":
    # Small, self-consistent shapes: x is NCHW (8, 4, 8, 8) -> in_dim = 256,
    # int_dim = 32, grid S=2, B=1, C=2 -> out_dim = 2*2*(1*5+2) = 28.
    conf = make_conf(S=2, B=1, C=2, in_dim=4 * 8 * 8, int_dim=32)

    key = jax.random.PRNGKey(0)
    k_x, k_p = jax.random.split(key)
    x = jax.random.normal(k_x, (8, 4, 8, 8), jnp.float32)
    params = init_params(k_p, conf)

    # One-time weight prep (BN fold, transpose, pad, bf16 cast) outside the
    # per-call path.
    folded = fold_bn_params(params, conf)

    out = fc_layer_forward(x, folded, conf)
    out = jax.block_until_ready(out)

    ref = fc_layer_ref(x, params, conf)
    assert out.shape == (8, conf.grid.S, conf.grid.S,
                         conf.grid.B * 5 + conf.grid.C), out.shape
    # bf16 MXU inputs, bf16 output writeback, approx reciprocal -> relaxed
    # tolerance vs the f32 reference.
    assert jnp.allclose(out, ref, atol=2e-2, rtol=2e-2), \
        float(jnp.max(jnp.abs(out - ref)))

    print("KERNEL_OK")
</pallas_src>

<mosaic_0001>
module attributes {stable_mosaic.version = 11 : i64} {
  func.func @fc_kernel(%arg0: i32, %arg1: memref<8x256xf32, #tpu.memory_space<vmem>>, %arg2: memref<256x32xbf16, #tpu.memory_space<vmem>>, %arg3: memref<1x32xf32, #tpu.memory_space<vmem>>, %arg4: memref<32x128xbf16, #tpu.memory_space<vmem>>, %arg5: memref<1x128xf32, #tpu.memory_space<vmem>>, %arg6: memref<8x128xbf16, #tpu.memory_space<vmem>>) attributes {dimension_semantics = [#tpu.dimension_semantics<parallel>], iteration_bounds = array<i64: 1>, scalar_prefetch = 0 : i64, scratch_operands = 0 : i64, tpu.core_type = #tpu.core_type<tc>, window_params = [{transform_indices = @transform_0, window_bounds = array<i64: 8, 256>}, {pipeline_mode = #tpu.pipeline_mode<synchronous>, transform_indices = @transform_1, window_bounds = array<i64: 256, 32>}, {pipeline_mode = #tpu.pipeline_mode<synchronous>, transform_indices = @transform_2, window_bounds = array<i64: 1, 32>}, {pipeline_mode = #tpu.pipeline_mode<synchronous>, transform_indices = @transform_3, window_bounds = array<i64: 32, 128>}, {pipeline_mode = #tpu.pipeline_mode<synchronous>, transform_indices = @transform_4, window_bounds = array<i64: 1, 128>}, {transform_indices = @transform_5, window_bounds = array<i64: 8, 128>}]} {
    %c0 = arith.constant 0 : index
    %c0_0 = arith.constant 0 : index
    %0 = vector.load %arg1[%c0, %c0_0] : memref<8x256xf32, #tpu.memory_space<vmem>>, vector<8x256xf32>
    %1 = arith.truncf %0 : vector<8x256xf32> to vector<8x256xbf16>
    %c0_1 = arith.constant 0 : index
    %c0_2 = arith.constant 0 : index
    %2 = vector.load %arg2[%c0_1, %c0_2] : memref<256x32xbf16, #tpu.memory_space<vmem>>, vector<256x32xbf16>
    %cst = arith.constant dense<0.000000e+00> : vector<8x32xf32>
    %3 = tpu.matmul %1, %2, %cst {dimension_numbers = #tpu.dot_dimension_numbers<[1], [0], [0], [1], [0, 0, 1, 1], [], []>} : vector<8x256xbf16>, vector<256x32xbf16>, vector<8x32xf32> -> vector<8x32xf32>
    %c0_3 = arith.constant 0 : index
    %c0_4 = arith.constant 0 : index
    %4 = vector.load %arg3[%c0_3, %c0_4] : memref<1x32xf32, #tpu.memory_space<vmem>>, vector<1x32xf32>
    %5 = vector.broadcast %4 : vector<1x32xf32> to vector<8x32xf32>
    %6 = arith.addf %3, %5 : vector<8x32xf32>
    %cst_5 = arith.constant 0.000000e+00 : f32
    %7 = vector.broadcast %cst_5 : f32 to vector<8x32xf32>
    %8 = arith.cmpf ogt, %6, %7 : vector<8x32xf32>
    %cst_6 = arith.constant 1.000000e-01 : f32
    %9 = vector.broadcast %cst_6 : f32 to vector<8x32xf32>
    %10 = arith.mulf %9, %6 : vector<8x32xf32>
    %11 = arith.select %8, %6, %10 : vector<8x32xi1>, vector<8x32xf32>
    %12 = arith.truncf %11 : vector<8x32xf32> to vector<8x32xbf16>
    %c0_7 = arith.constant 0 : index
    %c0_8 = arith.constant 0 : index
    %13 = vector.load %arg4[%c0_7, %c0_8] : memref<32x128xbf16, #tpu.memory_space<vmem>>, vector<32x128xbf16>
    %cst_9 = arith.constant dense<0.000000e+00> : vector<8x128xf32>
    %14 = tpu.matmul %12, %13, %cst_9 {dimension_numbers = #tpu.dot_dimension_numbers<[1], [0], [0], [1], [0, 0, 1, 1], [], []>} : vector<8x32xbf16>, vector<32x128xbf16>, vector<8x128xf32> -> vector<8x128xf32>
    %c0_10 = arith.constant 0 : index
    %c0_11 = arith.constant 0 : index
    %15 = vector.load %arg5[%c0_10, %c0_11] : memref<1x128xf32, #tpu.memory_space<vmem>>, vector<1x128xf32>
    %16 = vector.broadcast %15 : vector<1x128xf32> to vector<8x128xf32>
    %17 = arith.addf %14, %16 : vector<8x128xf32>
    %cst_12 = arith.constant -3.000000e+01 : f32
    %18 = vector.broadcast %cst_12 : f32 to vector<8x128xf32>
    %19 = arith.maximumf %17, %18 : vector<8x128xf32>
    %cst_13 = arith.constant 0.000000e+00 : f32
    %20 = vector.broadcast %cst_13 : f32 to vector<8x128xf32>
    %21 = arith.subf %20, %19 : vector<8x128xf32>
    %22 = math.exp %21 : vector<8x128xf32>
    %cst_14 = arith.constant 1.000000e+00 : f32
    %23 = vector.broadcast %cst_14 : f32 to vector<8x128xf32>
    %24 = arith.addf %23, %22 : vector<8x128xf32>
    %25 = tpu.reciprocal %24 {approx = true} : vector<8x128xf32> -> vector<8x128xf32>
    %cst_15 = arith.constant 0.000000e+00 : f32
    %cst_16 = arith.constant 1.000000e+00 : f32
    %26 = vector.broadcast %cst_15 : f32 to vector<8x128xf32>
    %27 = arith.maximumf %26, %25 : vector<8x128xf32>
    %28 = vector.broadcast %cst_16 : f32 to vector<8x128xf32>
    %29 = arith.minimumf %28, %27 : vector<8x128xf32>
    %30 = arith.truncf %29 : vector<8x128xf32> to vector<8x128xbf16>
    %c0_17 = arith.constant 0 : index
    %c0_18 = arith.constant 0 : index
    %31 = vector.load %arg6[%c0_17, %c0_18] : memref<8x128xbf16, #tpu.memory_space<vmem>>, vector<8x128xbf16>
    tpu.vector_store %arg6[%c0_17, %c0_18], %30 {strides = array<i32>} : memref<8x128xbf16, #tpu.memory_space<vmem>>, vector<8x128xbf16>,
    return
  }
  func.func @transform_0(%arg0: i32) -> (i32, i32) {
    %c0_i32 = arith.constant 0 : i32
    %c0_i32_0 = arith.constant 0 : i32
    return %arg0, %c0_i32 : i32, i32
  }
  func.func @transform_1(%arg0: i32) -> (i32, i32) {
    %c0_i32 = arith.constant 0 : i32
    %c0_i32_0 = arith.constant 0 : i32
    %c0_i32_1 = arith.constant 0 : i32
    return %c0_i32, %c0_i32_0 : i32, i32
  }
  func.func @transform_2(%arg0: i32) -> (i32, i32) {
    %c0_i32 = arith.constant 0 : i32
    %c0_i32_0 = arith.constant 0 : i32
    %c0_i32_1 = arith.constant 0 : i32
    return %c0_i32, %c0_i32_0 : i32, i32
  }
  func.func @transform_3(%arg0: i32) -> (i32, i32) {
    %c0_i32 = arith.constant 0 : i32
    %c0_i32_0 = arith.constant 0 : i32
    %c0_i32_1 = arith.constant 0 : i32
    return %c0_i32, %c0_i32_0 : i32, i32
  }
  func.func @transform_4(%arg0: i32) -> (i32, i32) {
    %c0_i32 = arith.constant 0 : i32
    %c0_i32_0 = arith.constant 0 : i32
    %c0_i32_1 = arith.constant 0 : i32
    return %c0_i32, %c0_i32_0 : i32, i32
  }
  func.func @transform_5(%arg0: i32) -> (i32, i32) {
    %c0_i32 = arith.constant 0 : i32
    %c0_i32_0 = arith.constant 0 : i32
    return %arg0, %c0_i32 : i32, i32
  }
}

</mosaic_0001>

<bundles_post_ra>
// kernel: tpu_custom_call.1
= control target key start
LH: loop header
LB: loop body
LE: loop exit
PB: predicated region body
PF: predicated region fallthrough
CT: control target
= control target key end

     0   :  { %s475_s0 = inlined_call_operand.vmem [shape: f32[8,256], index: 0, kind: input, shape index: {}]   ;;  %s476_s1 = inlined_call_operand.vmem [shape: bf16[256,32], index: 1, kind: input, shape index: {}]   ;;  %s477_s2 = inlined_call_operand.vmem [shape: f32[1,32], index: 2, kind: input, shape index: {}]   ;;  %s478_s3 = inlined_call_operand.vmem [shape: bf16[32,128], index: 3, kind: input, shape index: {}]   ;;  %s479_s4 = inlined_call_operand.vmem [shape: f32[1,128], index: 4, kind: input, shape index: {}]   ;;  %s480_s5 = inlined_call_operand.hbm [shape: bf16[8,128], index: 5, kind: output, shape index: {}]  }
   0x1   :  { %v331_v0 = vld [vmem:[%s476_s1 + $0x38] sm:$0xff]  ;;  %v330_v2 = vld [vmem:[%s476_s1 + $0x30] sm:$0xff]  ;;  %v329_v4 = vld [vmem:[%s476_s1 + $0x28] sm:$0xff] }
   0x2   :  { %v339_v1 = vld [vmem:[%s476_s1 + $0x78] sm:$0xff]  ;;  %158 = vmatpush.bf16.msra.mxu0 %v331_v0  ;;  %v338_v3 = vld [vmem:[%s476_s1 + $0x70] sm:$0xff]  ;;  %v337_v5 = vld [vmem:[%s476_s1 + $0x68] sm:$0xff] }
   0x3   :  { %171 = vmatpush.bf16.msra.mxu1 %v339_v1 }
   0x6   :  { %159 = vmatpush.bf16.msra.mxu0 %v330_v2 }
   0x7   :  { %172 = vmatpush.bf16.msra.mxu1 %v338_v3 }
   0x8   :  { %10 = vsyncpa [#allocation3], 0  ;;  %v328_v6 = vld [vmem:[%s476_s1 + $0x20] sm:$0xff]  ;;  %v327_v8 = vld [vmem:[%s476_s1 + $0x18] sm:$0xff]  ;;  %vm208_vm1 = vcmask 261120   ;;  %s242_s12 = sshll.u32 %s480_s5, 4  ;;  %s243_s12 = int_to_ptr.hbm [resolvable:$true] %s242_s12 }
   0x9   :  { %v336_v7 = vld [vmem:[%s476_s1 + $0x60] sm:$0xff]  ;;  %v335_v9 = vld [vmem:[%s476_s1 + $0x58] sm:$0xff]  ;;  %v326_v10 = vld [vmem:[%s476_s1 + $0x10] sm:$0xff] }
   0xa   :  { %160 = vmatpush.bf16.msra.mxu0 %v329_v4  ;;  %v334_v11 = vld [vmem:[%s476_s1 + $0x50] sm:$0xff]  ;;  %v325_v12 = vld [vmem:[%s476_s1 + $0x8] sm:$0xff]  ;;  %v324_v14 = vld [vmem:[%s476_s1] sm:$0xff] }
   0xb   :  { %173 = vmatpush.bf16.msra.mxu1 %v337_v5  ;;  %v333_v13 = vld [vmem:[%s476_s1 + $0x48] sm:$0xff]  ;;  %v332_v15 = vld [vmem:[%s476_s1 + $0x40] sm:$0xff] }
   0xc   :  { %v22_v16 = vld [vmem:[%s475_s0] sm:$0xff]  ;;  %v23_v17 = vld [vmem:[%s475_s0 + $0x8] sm:$0xff] }
   0xd   :  { %v24_v18 = vpack.c.bf16 %v22_v16, %v22_v16  ;;  %v25_v19 = vpack.c.bf16 %v23_v17, %v23_v17  ;;  %v341_v20 = vld [vmem:[%s478_s3 + $0x8] sm:$0xff]  ;;  %v340_v21 = vld [vmem:[%s478_s3] sm:$0xff] }
   0xe   :  { %161 = vmatpush.bf16.msra.mxu0 %v328_v6  ;;  %218 = vmatpush.bf16.msra.mxu2 %v341_v20  ;;  %v343_v22 = vld [vmem:[%s477_s2] ss:$0 sm:$0xff]  ;;  %s375_s2 = smov [#allocation2]  }
   0xf   :  { %174 = vmatpush.bf16.msra.mxu1 %v336_v7  ;;  %v344_v32 = vld [vmem:[%s479_s4] ss:$0 sm:$0xff]  ;;  %s240_s3 = sshll.u32 %s375_s2, 4  ;;  %s241_s3 = int_to_ptr.vmem [resolvable:$true] %s240_s3 }
  0x12   :  { %162 = vmatpush.bf16.msra.mxu0 %v327_v8  ;;  %219 = vmatpush.bf16.msra.mxu2 %v340_v21 }
  0x13   :  { %175 = vmatpush.bf16.msra.mxu1 %v335_v9 }
  0x16   :  { %163 = vmatpush.bf16.msra.mxu0 %v326_v10 }
  0x17   :  { %176 = vmatpush.bf16.msra.mxu1 %v334_v11 }
  0x1a   :  { %164 = vmatpush.bf16.msra.mxu0 %v325_v12 }
  0x1b   :  { %177 = vmatpush.bf16.msra.mxu1 %v333_v13 }
  0x1e   :  { %165 = vmatpush.bf16.msra.mxu0 %v324_v14 }
  0x1f   :  { %178 = vmatpush.bf16.msra.mxu1 %v332_v15 }
  0x21   :  { %166 = vmatmul.bf16.vlgmr.msra.gmra.mxu0 %v24_v18 }
  0x22   :  { %179 = vmatmul.bf16.vlgmr.msra.gmra.mxu1 %v25_v19 }
  0x9e   :  { %v167_v23 = vpop.f32.mrf.mxu0 }
  0x9f   :  { %v180_v24 = vpop.f32.mrf.mxu1  ;;  %v168_v25 = vadd.f32 %v343_v22, %v167_v23 }
  0xa1   :  { %v181_v26 = vadd.f32 %v180_v24, %v168_v25 }
  0xa3   :  { %vm184_vm0 = vcmp.gt.f32.partialorder %v181_v26, 0.0  ;;  %v185_v27 = vmul.f32 0.1, %v181_v26 }
  0xa5   :  { %v186_v28 = vsel %vm184_vm0, %v181_v26, %v185_v27 }
  0xa6   :  { %v169_v29 = vpop.f32.mrf.mxu0  ;;  %v187_v31 = vpack.c.bf16 %v186_v28, %v186_v28 }
  0xa7   :  { %v182_v30 = vpop.f32.mrf.mxu1 }
  0xa8   :  { %323 = vmatmul.msk.bf16.vlgmr.msra.gmra.mxu2 %vm208_vm1, %v187_v31 }
 0x12b   :  { %v221_v33 = vpop.f32.mrf.mxu2 }
 0x12c   :  { %v222_v34 = vadd.f32 %v344_v32, %v221_v33 }
 0x12e   :  { %v225_v35 = vmax.f32 %v222_v34, -30.0 }
 0x130   :  { %v226_v36 = vsub.f32 0.0, %v225_v35 }
 0x132   :  { %v227_v37 = vmul.f32 1.442695, %v226_v36 }
 0x133   :  { %v223_v38 = vpop.f32.mrf.mxu2 }
 0x134   :  { %345 = vpow2.f32 %v227_v37 }
 0x13a   :  { %v346_v39 = vpop.eup %345 }
 0x13b   :  { %v229_v40 = vadd.f32 1.0, %v346_v39 }
 0x13d   :  { %347 = vrcp.f32 %v229_v40 }
 0x143   :  { %v348_v41 = vpop.eup %347 }
 0x144   :  { %v231_v42 = vmax.f32 %v348_v41, 0.0 }
 0x146   :  { %v232_v43 = vmin.f32 %v231_v42, 1.0 }
 0x148   :  { %v233_v44 = vpack.c.bf16 %v232_v43, %v232_v43 }
 0x14a   :  { %234 = vst [vmem:[#allocation2] sm:$0xf] %v233_v44 }
 0x14b   :  { %245 = dma.vmem_to_hbm [thread:$0]  %s241_s3, 64, %s243_s12, [#allocation3]  }
 0x14c   :  { %373 = dma.done.wait [#allocation3], 64  }
 0x14d   :  { %374 = vsyncadd [#allocation3], 4294967232 }
 0x14e   :  { %250 = vsyncpa [#allocation3], 1 }

</bundles_post_ra>
